<compile_context>
chip_gen: v5e
topology: v5e:2x2
jax: 0.10.0
libtpu: 0.0.40
codegen_flags: <defaults>
</compile_context>

<pallas_src>
import functools

import jax
import jax.numpy as jnp
from jax.experimental import pallas as pl
from jax.experimental.pallas import tpu as pltpu

_VMEM_BLOCK_BUDGET_BYTES = 16 * 1024 * 1024   # in+out blocks, double buffered
_VMEM_LIMIT_BYTES = 32 * 1024 * 1024          # scoped VMEM request (v5e/v6e/v7x safe)

_IMPL_CACHE = {}


def _round_up(n, m):
    return -(-n // m) * m


def _pick_tile_t(T, per_row_bytes, budget_bytes, need_mult_of_8):
    """Largest divisor of T whose double-buffered padded block footprint fits.

    If `need_mult_of_8`, tT is the second-minor dim of the output block and must
    be a multiple of 8 or equal to the full dim (Mosaic (8,128) rule).
    """
    max_rows = max(1, budget_bytes // max(per_row_bytes, 1))
    divisors = [d for d in range(1, T + 1) if T % d == 0]
    if need_mult_of_8:
        divisors = [d for d in divisors if d % 8 == 0 or d == T]
    fitting = [d for d in divisors if d <= max_rows]
    if fitting:
        return max(fitting)
    return min(divisors)   # smallest legal tile; VMEM limit keeps headroom


def _kernel_paired(df_order, x_ref, o_ref):
    # x_ref: (1, tT, F, 2*O)   o_ref: (1, O, tT, F, 2)
    # Statically unrolled over the small df_order axis: each step copies a
    # static 2-wide lane slice of the input block into output slot o.
    for o in range(df_order):
        o_ref[0, o] = x_ref[0, :, :, 2 * o:2 * o + 2]


def _kernel_lane_dense(df_order, df_bins, x_ref, o_ref):
    # x_ref: (1, tT, F, 2*O)   o_ref: (1, O, tT, 2*F)   (lane-dense output rows)
    tT = x_ref.shape[1]
    for o in range(df_order):
        pair = x_ref[0, :, :, 2 * o:2 * o + 2]           # (tT, F, 2)
        o_ref[0, o] = pair.reshape(tT, 2 * df_bins)      # full-width vst


def _build_pallas(B, T, F, O, dtype, *, lane_dense_out):
    isz = jnp.dtype(dtype).itemsize
    pad_f = _round_up(F, 8)

    # Padded VMEM bytes per T-row for the in/out blocks (x2 for double buffering).
    in_row = pad_f * 128 * isz                            # (F, 2O) -> (pad8(F), 128)
    if lane_dense_out:
        out_row = O * _round_up(2 * F, 128) * isz         # (tT, 2F) -> (tT, pad128(2F))
        need8 = True                                      # tT is second-minor dim
    else:
        out_row = O * pad_f * 128 * isz                   # (F, 2) -> (pad8(F), 128)
        need8 = False
    per_row = 2 * (in_row + out_row)

    tT = _pick_tile_t(T, per_row, _VMEM_BLOCK_BUDGET_BYTES, need8)
    grid = (B, T // tT)

    in_spec = pl.BlockSpec((1, tT, F, 2 * O), lambda b, t: (b, t, 0, 0))
    if lane_dense_out:
        out_spec = pl.BlockSpec((1, O, tT, 2 * F), lambda b, t: (b, 0, t, 0))
        out_shape = jax.ShapeDtypeStruct((B, O, T, 2 * F), dtype)
        kernel = functools.partial(_kernel_lane_dense, O, F)
    else:
        out_spec = pl.BlockSpec((1, O, tT, F, 2), lambda b, t: (b, 0, t, 0, 0))
        out_shape = jax.ShapeDtypeStruct((B, O, T, F, 2), dtype)
        kernel = functools.partial(_kernel_paired, O)

    cost = pl.CostEstimate(
        flops=0,
        transcendentals=0,
        bytes_accessed=2 * B * T * F * 2 * O * isz,       # one read + one write
    )
    return pl.pallas_call(
        kernel,
        out_shape=out_shape,
        grid_spec=pltpu.PrefetchScalarGridSpec(
            num_scalar_prefetch=0,
            grid=grid,
            in_specs=[in_spec],
            out_specs=out_spec,
        ),
        compiler_params=pltpu.CompilerParams(
            dimension_semantics=("parallel", "parallel"),
            vmem_limit_bytes=_VMEM_LIMIT_BYTES,
        ),
        cost_estimate=cost,
    )


def _select_impl(B, T, F, O, dtype):
    """Deterministic per-shape selection: use the lane-dense layout iff it
    AOT-compiles and is bit-exact; otherwise the always-lowering paired layout.
    No runtime benchmarking (selection happens once per shape/dtype)."""
    key = (B, T, F, O, jnp.dtype(dtype).name)
    if key in _IMPL_CACHE:
        return _IMPL_CACHE[key]

    chosen = jax.jit(_build_pallas(B, T, F, O, dtype, lane_dense_out=False))
    lane_dense = False
    try:
        fast = jax.jit(_build_pallas(B, T, F, O, dtype, lane_dense_out=True))
        x_spec = jax.ShapeDtypeStruct((B, T, F, 2 * O), jnp.dtype(dtype))
        fast.lower(x_spec).compile()                      # Mosaic accepts the relayout?
        n = B * T * F * 2 * O
        x_probe = ((jnp.arange(n, dtype=jnp.float32) % 8191.0)
                   .astype(dtype).reshape(B, T, F, 2 * O))
        got = jax.block_until_ready(fast(x_probe)).reshape(B, O, T, F, 2)
        want = jnp.transpose(x_probe.reshape(B, T, F, O, 2), (0, 3, 1, 2, 4))
        if bool(jnp.array_equal(got, want)):
            chosen, lane_dense = fast, True
    except Exception:
        pass

    _IMPL_CACHE[key] = (chosen, lane_dense)
    return chosen, lane_dense


def df_output_reshape_mf(coefs: jax.Array, df_order: int, df_bins: int) -> jax.Array:
    """coefs: [B, T, F, O*2] -> [B, O, T, F, 2]"""
    B, T, F, C2 = coefs.shape
    assert F == df_bins, f"expected F == df_bins ({df_bins}), got {F}"
    assert C2 == 2 * df_order, f"expected last dim == 2*df_order ({2 * df_order}), got {C2}"

    fn, lane_dense = _select_impl(B, T, F, df_order, coefs.dtype)
    out = fn(coefs)
    if lane_dense:
        # Metadata-only (contiguous) reshape: (B, O, T, 2F) -> (B, O, T, F, 2).
        out = out.reshape(B, df_order, T, F, 2)
    return out


if __name__ == "__main__":
    # Small, module-consistent shapes.
    B, T = 2, 8
    df_order = 4
    df_bins = 16

    key = jax.random.PRNGKey(0)
    coefs = jax.random.normal(key, (B, T, df_bins, df_order * 2), dtype=jnp.float32)

    out = df_output_reshape_mf(coefs, df_order, df_bins)
    out = jax.block_until_ready(out)

    # Pure-JAX reference (mirrors torch view + permute exactly).
    ref = jnp.transpose(
        coefs.reshape(B, T, df_bins, df_order, 2), (0, 3, 1, 2, 4)
    )

    assert out.shape == (B, df_order, T, df_bins, 2), out.shape
    assert out.dtype == coefs.dtype
    assert jnp.array_equal(out, ref), "mismatch vs reference"

    print("KERNEL_OK")
</pallas_src>

<mosaic_0001>
module attributes {stable_mosaic.version = 11 : i64} {
  func.func @_kernel_paired(%arg0: i32, %arg1: i32, %arg2: memref<1x8x16x8xf32, #tpu.memory_space<vmem>>, %arg3: memref<1x4x8x16x2xf32, #tpu.memory_space<vmem>>) attributes {dimension_semantics = [#tpu.dimension_semantics<parallel>, #tpu.dimension_semantics<parallel>], iteration_bounds = array<i64: 2, 1>, scalar_prefetch = 0 : i64, scratch_operands = 0 : i64, tpu.core_type = #tpu.core_type<tc>, window_params = [{transform_indices = @transform_0, window_bounds = array<i64: 1, 8, 16, 8>}, {transform_indices = @transform_1, window_bounds = array<i64: 1, 4, 8, 16, 2>}]} {
    %c0 = arith.constant 0 : index
    %c0_0 = arith.constant 0 : index
    %c0_1 = arith.constant 0 : index
    %c0_2 = arith.constant 0 : index
    %0 = vector.load %arg2[%c0, %c0_0, %c0_1, %c0_2] : memref<1x8x16x8xf32, #tpu.memory_space<vmem>>, vector<1x8x16x2xf32>
    %1 = vector.shape_cast %0 : vector<1x8x16x2xf32> to vector<8x16x2xf32>
    %c0_3 = arith.constant 0 : index
    %c0_4 = arith.constant 0 : index
    %c0_5 = arith.constant 0 : index
    %c0_6 = arith.constant 0 : index
    %c0_7 = arith.constant 0 : index
    %2 = vector.load %arg3[%c0_3, %c0_4, %c0_5, %c0_6, %c0_7] : memref<1x4x8x16x2xf32, #tpu.memory_space<vmem>>, vector<1x1x8x16x2xf32>
    %3 = vector.shape_cast %2 : vector<1x1x8x16x2xf32> to vector<8x16x2xf32>
    %4 = vector.shape_cast %1 : vector<8x16x2xf32> to vector<1x1x8x16x2xf32>
    tpu.vector_store %arg3[%c0_3, %c0_4, %c0_5, %c0_6, %c0_7], %4 {strides = array<i32>} : memref<1x4x8x16x2xf32, #tpu.memory_space<vmem>>, vector<1x1x8x16x2xf32>,
    %c0_8 = arith.constant 0 : index
    %c0_9 = arith.constant 0 : index
    %c0_10 = arith.constant 0 : index
    %c2 = arith.constant 2 : index
    %5 = vector.load %arg2[%c0_8, %c0_9, %c0_10, %c2] : memref<1x8x16x8xf32, #tpu.memory_space<vmem>>, vector<1x8x16x2xf32>
    %6 = vector.shape_cast %5 : vector<1x8x16x2xf32> to vector<8x16x2xf32>
    %c0_11 = arith.constant 0 : index
    %c1 = arith.constant 1 : index
    %c0_12 = arith.constant 0 : index
    %c0_13 = arith.constant 0 : index
    %c0_14 = arith.constant 0 : index
    %7 = vector.load %arg3[%c0_11, %c1, %c0_12, %c0_13, %c0_14] : memref<1x4x8x16x2xf32, #tpu.memory_space<vmem>>, vector<1x1x8x16x2xf32>
    %8 = vector.shape_cast %7 : vector<1x1x8x16x2xf32> to vector<8x16x2xf32>
    %9 = vector.shape_cast %6 : vector<8x16x2xf32> to vector<1x1x8x16x2xf32>
    tpu.vector_store %arg3[%c0_11, %c1, %c0_12, %c0_13, %c0_14], %9 {strides = array<i32>} : memref<1x4x8x16x2xf32, #tpu.memory_space<vmem>>, vector<1x1x8x16x2xf32>,
    %c0_15 = arith.constant 0 : index
    %c0_16 = arith.constant 0 : index
    %c0_17 = arith.constant 0 : index
    %c4 = arith.constant 4 : index
    %10 = vector.load %arg2[%c0_15, %c0_16, %c0_17, %c4] : memref<1x8x16x8xf32, #tpu.memory_space<vmem>>, vector<1x8x16x2xf32>
    %11 = vector.shape_cast %10 : vector<1x8x16x2xf32> to vector<8x16x2xf32>
    %c0_18 = arith.constant 0 : index
    %c2_19 = arith.constant 2 : index
    %c0_20 = arith.constant 0 : index
    %c0_21 = arith.constant 0 : index
    %c0_22 = arith.constant 0 : index
    %12 = vector.load %arg3[%c0_18, %c2_19, %c0_20, %c0_21, %c0_22] : memref<1x4x8x16x2xf32, #tpu.memory_space<vmem>>, vector<1x1x8x16x2xf32>
    %13 = vector.shape_cast %12 : vector<1x1x8x16x2xf32> to vector<8x16x2xf32>
    %14 = vector.shape_cast %11 : vector<8x16x2xf32> to vector<1x1x8x16x2xf32>
    tpu.vector_store %arg3[%c0_18, %c2_19, %c0_20, %c0_21, %c0_22], %14 {strides = array<i32>} : memref<1x4x8x16x2xf32, #tpu.memory_space<vmem>>, vector<1x1x8x16x2xf32>,
    %c0_23 = arith.constant 0 : index
    %c0_24 = arith.constant 0 : index
    %c0_25 = arith.constant 0 : index
    %c6 = arith.constant 6 : index
    %15 = vector.load %arg2[%c0_23, %c0_24, %c0_25, %c6] : memref<1x8x16x8xf32, #tpu.memory_space<vmem>>, vector<1x8x16x2xf32>
    %16 = vector.shape_cast %15 : vector<1x8x16x2xf32> to vector<8x16x2xf32>
    %c0_26 = arith.constant 0 : index
    %c3 = arith.constant 3 : index
    %c0_27 = arith.constant 0 : index
    %c0_28 = arith.constant 0 : index
    %c0_29 = arith.constant 0 : index
    %17 = vector.load %arg3[%c0_26, %c3, %c0_27, %c0_28, %c0_29] : memref<1x4x8x16x2xf32, #tpu.memory_space<vmem>>, vector<1x1x8x16x2xf32>
    %18 = vector.shape_cast %17 : vector<1x1x8x16x2xf32> to vector<8x16x2xf32>
    %19 = vector.shape_cast %16 : vector<8x16x2xf32> to vector<1x1x8x16x2xf32>
    tpu.vector_store %arg3[%c0_26, %c3, %c0_27, %c0_28, %c0_29], %19 {strides = array<i32>} : memref<1x4x8x16x2xf32, #tpu.memory_space<vmem>>, vector<1x1x8x16x2xf32>,
    return
  }
  func.func @transform_0(%arg0: i32, %arg1: i32) -> (i32, i32, i32, i32) {
    %c0_i32 = arith.constant 0 : i32
    %c0_i32_0 = arith.constant 0 : i32
    %c0_i32_1 = arith.constant 0 : i32
    return %arg0, %arg1, %c0_i32, %c0_i32_0 : i32, i32, i32, i32
  }
  func.func @transform_1(%arg0: i32, %arg1: i32) -> (i32, i32, i32, i32, i32) {
    %c0_i32 = arith.constant 0 : i32
    %c0_i32_0 = arith.constant 0 : i32
    %c0_i32_1 = arith.constant 0 : i32
    %c0_i32_2 = arith.constant 0 : i32
    return %arg0, %c0_i32, %arg1, %c0_i32_0, %c0_i32_1 : i32, i32, i32, i32, i32
  }
}

</mosaic_0001>

<bundles_post_ra>
// kernel: tpu_custom_call.1
= control target key start
LH: loop header
LB: loop body
LE: loop exit
PB: predicated region body
PF: predicated region fallthrough
CT: control target
= control target key end

     0   :  { %s706_s6 = smov 0   ;;  %s708_s7 = smov 0   ;;  %s989_s0 = inlined_call_operand.vmem [shape: f32[2,8,16,8], index: 0, kind: input, shape index: {}]   ;;  %s990_s1 = inlined_call_operand.vmem [shape: f32[2,4,8,16,2], index: 1, kind: output, shape index: {}]  }
   0x1   :  { %s710_s8 = smov 0  }
   0x2 LB: > { %s23_s9 = sadd.s32 1, %s687_s7  ;;  %p585_p0 = scmp.ge.s32.totalorder %s691_s8, 1  ;;  %s691_s8 = sphi %s710_s8, %s11_s8   ;;  %s687_s7 = sphi %s708_s7, %s992_s7   ;;  %s683_s6 = sphi %s706_s6, %s991_s6  }
   0x3   : > { %p25_p1 = scmp.ge.s32.totalorder %s23_s9, 2  ;;  %p109_p2 = scmp.lt.s32.totalorder %s691_s8, 3 }
   0x5   : > { %s994_s9 = smov (%p25_p1, %s23_s9), 0  ;;  %p110_p3 = pnand %p585_p0, %p109_p2 }
   0x6   : > { %p140_p4 = scmp.lt.s32.totalorder (!%p110_p3), %s683_s6, 1  ;;  %s693_s14 = smov (!%p110_p3), 126  }
   0x7   : > { %113 = sbr.rel (%p110_p3) target bundleno = 253 (0xfd), region = 24  ;;  %s694_s15 = smov (!%p110_p3), 124  }
   0x8   : > { %s695_s20 = smov (!%p110_p3), 122  }
   0xc   : > { %s996_s6 = smov (!%p140_p4, %s683_s6), 1  ;;  %vm177_vm0 = vcmask 15360  }
   0xd   : > { %s640_s10 = sshll.u32 %s996_s6, 7  ;;  %s641_s16 = sshll.u32 %s996_s6, 9 }
   0xe   : > { %s730_s13 = scalar_lea.vmem %s989_s0, %s640_s10  ;;  %s812_s19 = scalar_lea.vmem %s990_s1, %s641_s16 }
   0xf   : > { %v196_v0 = vld [vmem:[%s730_s13 + $0x10] sm:$0xff]  ;;  %v194_v1 = vld [vmem:[%s730_s13] sm:$0xff]  ;;  %v197_v3 = vld [vmem:[%s730_s13 + $0x18] sm:$0xff] }
  0x10   : > { %230 = vrot.lane.b32.xlu1 %v196_v0, %s693_s14  ;;  %226 = vrot.lane.b32.xlu0 %v194_v1, %s693_s14  ;;  %v737_v2 = vld [vmem:[%s730_s13 + $0x20] sm:$0xff]  ;;  %v195_v4 = vld [vmem:[%s730_s13 + $0x8] sm:$0xff] }
  0x11   : > { %234 = vrot.lane.b32.xlu2 %v737_v2, %s693_s14  ;;  %v744_v5 = vld [vmem:[%s730_s13 + $0x28] sm:$0xff]  ;;  %v751_v6 = vld [vmem:[%s730_s13 + $0x38] sm:$0xff]  ;;  %v754_v7 = vld [vmem:[%s730_s13 + $0x30] sm:$0xff] }
  0x12   : > { %v757_v8 = vld [vmem:[%s730_s13 + $0x40] sm:$0xff]  ;;  %v766_v9 = vld [vmem:[%s730_s13 + $0x50] sm:$0xff]  ;;  %v203_v10 = vld [vmem:[%s730_s13 + $0x48] sm:$0xff]  ;;  %178 = vst.msk [vmem:[%s812_s19] sm:$0xff] %vm177_vm0, %v194_v1 }
  0x13   : > { %v770_v11 = vld [vmem:[%s730_s13 + $0x58] sm:$0xff]  ;;  %v778_v12 = vld [vmem:[%s730_s13 + $0x68] sm:$0xff]  ;;  %v781_v13 = vld [vmem:[%s730_s13 + $0x60] sm:$0xff]  ;;  %179 = vst.msk [vmem:[%s812_s19 + $0x8] sm:$0xff] %vm177_vm0, %v195_v4 }
  0x14   : > { %v784_v14 = vld [vmem:[%s730_s13 + $0x70] sm:$0xff]  ;;  %v793_v15 = vld [vmem:[%s730_s13 + $0x78] sm:$0xff]  ;;  %180 = vst.msk [vmem:[%s812_s19 + $0x10] sm:$0xff] %vm177_vm0, %v196_v0 }
  0x15   : > { %181 = vst.msk [vmem:[%s812_s19 + $0x18] sm:$0xff] %vm177_vm0, %v197_v3 }
  0x16   : > { %182 = vst.msk [vmem:[%s812_s19 + $0x20] sm:$0xff] %vm177_vm0, %v737_v2 }
  0x17   : > { %183 = vst.msk [vmem:[%s812_s19 + $0x28] sm:$0xff] %vm177_vm0, %v744_v5 }
  0x18   : > { %232 = vrot.lane.b32.xlu1 %v197_v3, %s693_s14  ;;  %228 = vrot.lane.b32.xlu0 %v195_v4, %s693_s14  ;;  %184 = vst.msk [vmem:[%s812_s19 + $0x30] sm:$0xff] %vm177_vm0, %v754_v7 }
  0x19   : > { %236 = vrot.lane.b32.xlu2 %v744_v5, %s693_s14  ;;  %185 = vst.msk [vmem:[%s812_s19 + $0x38] sm:$0xff] %vm177_vm0, %v751_v6 }
  0x1a   : > { %186 = vst.msk [vmem:[%s812_s19 + $0x40] sm:$0xff] %vm177_vm0, %v757_v8 }
  0x1b   : > { %187 = vst.msk [vmem:[%s812_s19 + $0x48] sm:$0xff] %vm177_vm0, %v203_v10 }
  0x1c   : > { %188 = vst.msk [vmem:[%s812_s19 + $0x50] sm:$0xff] %vm177_vm0, %v766_v9 }
  0x1d   : > { %189 = vst.msk [vmem:[%s812_s19 + $0x58] sm:$0xff] %vm177_vm0, %v770_v11 }
  0x1e   : > { %190 = vst.msk [vmem:[%s812_s19 + $0x60] sm:$0xff] %vm177_vm0, %v781_v13 }
  0x1f   : > { %191 = vst.msk [vmem:[%s812_s19 + $0x68] sm:$0xff] %vm177_vm0, %v778_v12 }
  0x20   : > { %240 = vrot.lane.b32.xlu1 %v751_v6, %s693_s14  ;;  %238 = vrot.lane.b32.xlu0 %v754_v7, %s693_s14  ;;  %192 = vst.msk [vmem:[%s812_s19 + $0x70] sm:$0xff] %vm177_vm0, %v784_v14 }
  0x21   : > { %242 = vrot.lane.b32.xlu2 %v757_v8, %s693_s14  ;;  %193 = vst.msk [vmem:[%s812_s19 + $0x78] sm:$0xff] %vm177_vm0, %v793_v15 }
  0x28   : > { %246 = vrot.lane.b32.xlu1 %v766_v9, %s693_s14  ;;  %244 = vrot.lane.b32.xlu0 %v203_v10, %s693_s14 }
  0x29   : > { %248 = vrot.lane.b32.xlu2 %v770_v11, %s693_s14 }
  0x30   : > { %252 = vrot.lane.b32.xlu1 %v778_v12, %s693_s14  ;;  %250 = vrot.lane.b32.xlu0 %v781_v13, %s693_s14 }
  0x31   : > { %254 = vrot.lane.b32.xlu2 %v784_v14, %s693_s14 }
  0x38   : > { %323 = vrot.lane.b32.xlu1 %v194_v1, %s694_s15  ;;  %256 = vrot.lane.b32.xlu0 %v793_v15, %s693_s14 }
  0x39   : > { %325 = vrot.lane.b32.xlu2 %v195_v4, %s694_s15 }
  0x40   : > { %329 = vrot.lane.b32.xlu1 %v197_v3, %s694_s15  ;;  %327 = vrot.lane.b32.xlu0 %v196_v0, %s694_s15 }
  0x41   : > { %331 = vrot.lane.b32.xlu2 %v737_v2, %s694_s15 }
  0x48   : > { %335 = vrot.lane.b32.xlu1 %v754_v7, %s694_s15  ;;  %333 = vrot.lane.b32.xlu0 %v744_v5, %s694_s15 }
  0x49   : > { %337 = vrot.lane.b32.xlu2 %v751_v6, %s694_s15 }
  0x50   : > { %341 = vrot.lane.b32.xlu1 %v203_v10, %s694_s15  ;;  %339 = vrot.lane.b32.xlu0 %v757_v8, %s694_s15 }
  0x51   : > { %343 = vrot.lane.b32.xlu2 %v766_v9, %s694_s15 }
  0x58   : > { %347 = vrot.lane.b32.xlu1 %v781_v13, %s694_s15  ;;  %345 = vrot.lane.b32.xlu0 %v770_v11, %s694_s15 }
  0x59   : > { %349 = vrot.lane.b32.xlu2 %v778_v12, %s694_s15 }
  0x60   : > { %353 = vrot.lane.b32.xlu1 %v793_v15, %s694_s15  ;;  %351 = vrot.lane.b32.xlu0 %v784_v14, %s694_s15 }
  0x61   : > { %420 = vrot.lane.b32.xlu2 %v194_v1, %s695_s20 }
  0x68   : > { %424 = vrot.lane.b32.xlu1 %v196_v0, %s695_s20  ;;  %422 = vrot.lane.b32.xlu0 %v195_v4, %s695_s20 }
  0x69   : > { %426 = vrot.lane.b32.xlu2 %v197_v3, %s695_s20 }
  0x6b   : > { %v235_v16 = vpop.permute.xlu2 %234 }
  0x6c   : > { %594 = vst.msk [vmem:[%s812_s19 + $0xa0] sm:$0xff] %vm177_vm0, %v235_v16 }
  0x70   : > { %430 = vrot.lane.b32.xlu1 %v744_v5, %s695_s20  ;;  %428 = vrot.lane.b32.xlu0 %v737_v2, %s695_s20 }
  0x71   : > { %432 = vrot.lane.b32.xlu2 %v754_v7, %s695_s20 }
  0x73   : > { %v237_v17 = vpop.permute.xlu2 %236 }
  0x74   : > { %595 = vst.msk [vmem:[%s812_s19 + $0xa8] sm:$0xff] %vm177_vm0, %v237_v17 }
  0x78   : > { %436 = vrot.lane.b32.xlu1 %v757_v8, %s695_s20  ;;  %434 = vrot.lane.b32.xlu0 %v751_v6, %s695_s20 }
  0x79   : > { %438 = vrot.lane.b32.xlu2 %v203_v10, %s695_s20 }
  0x7b   : > { %v243_v18 = vpop.permute.xlu2 %242 }
  0x7c   : > { %598 = vst.msk [vmem:[%s812_s19 + $0xc0] sm:$0xff] %vm177_vm0, %v243_v18 }
  0x80   : > { %442 = vrot.lane.b32.xlu1 %v770_v11, %s695_s20  ;;  %440 = vrot.lane.b32.xlu0 %v766_v9, %s695_s20 }
  0x81   : > { %444 = vrot.lane.b32.xlu2 %v781_v13, %s695_s20 }
  0x82   : > { %v231_v19 = vpop.permute.xlu1 %230  ;;  %v227_v20 = vpop.permute.xlu0 %226 }
  0x83   : > { %592 = vst.msk [vmem:[%s812_s19 + $0x90] sm:$0xff] %vm177_vm0, %v231_v19  ;;  %v249_v21 = vpop.permute.xlu2 %248 }
  0x84   : > { %590 = vst.msk [vmem:[%s812_s19 + $0x80] sm:$0xff] %vm177_vm0, %v227_v20 }
  0x85   : > { %601 = vst.msk [vmem:[%s812_s19 + $0xd8] sm:$0xff] %vm177_vm0, %v249_v21 }
  0x88   : > { %448 = vrot.lane.b32.xlu1 %v784_v14, %s695_s20  ;;  %446 = vrot.lane.b32.xlu0 %v778_v12, %s695_s20 }
  0x89   : > { %450 = vrot.lane.b32.xlu2 %v793_v15, %s695_s20 }
  0x8a   : > { %v233_v22 = vpop.permute.xlu1 %232  ;;  %v229_v23 = vpop.permute.xlu0 %228 }
  0x8b   : > { %593 = vst.msk [vmem:[%s812_s19 + $0x98] sm:$0xff] %vm177_vm0, %v233_v22  ;;  %v255_v24 = vpop.permute.xlu2 %254 }
  0x8c   : > { %591 = vst.msk [vmem:[%s812_s19 + $0x88] sm:$0xff] %vm177_vm0, %v229_v23 }
  0x8d   : > { %604 = vst.msk [vmem:[%s812_s19 + $0xf0] sm:$0xff] %vm177_vm0, %v255_v24 }
  0x92   : > { %v241_v25 = vpop.permute.xlu1 %240  ;;  %v239_v26 = vpop.permute.xlu0 %238 }
  0x93   : > { %597 = vst.msk [vmem:[%s812_s19 + $0xb8] sm:$0xff] %vm177_vm0, %v241_v25  ;;  %v326_v27 = vpop.permute.xlu2 %325 }
  0x94   : > { %596 = vst.msk [vmem:[%s812_s19 + $0xb0] sm:$0xff] %vm177_vm0, %v239_v26 }
  0x95   : > { %607 = vst.msk [vmem:[%s812_s19 + $0x108] sm:$0xff] %vm177_vm0, %v326_v27 }
  0x9a   : > { %v247_v28 = vpop.permute.xlu1 %246  ;;  %v245_v29 = vpop.permute.xlu0 %244 }
  0x9b   : > { %600 = vst.msk [vmem:[%s812_s19 + $0xd0] sm:$0xff] %vm177_vm0, %v247_v28  ;;  %v332_v30 = vpop.permute.xlu2 %331 }
  0x9c   : > { %599 = vst.msk [vmem:[%s812_s19 + $0xc8] sm:$0xff] %vm177_vm0, %v245_v29 }
  0x9d   : > { %610 = vst.msk [vmem:[%s812_s19 + $0x120] sm:$0xff] %vm177_vm0, %v332_v30 }
  0xa2   : > { %v253_v31 = vpop.permute.xlu1 %252  ;;  %v251_v32 = vpop.permute.xlu0 %250 }
  0xa3   : > { %603 = vst.msk [vmem:[%s812_s19 + $0xe8] sm:$0xff] %vm177_vm0, %v253_v31  ;;  %v338_v33 = vpop.permute.xlu2 %337 }
  0xa4   : > { %602 = vst.msk [vmem:[%s812_s19 + $0xe0] sm:$0xff] %vm177_vm0, %v251_v32 }
  0xa5   : > { %613 = vst.msk [vmem:[%s812_s19 + $0x138] sm:$0xff] %vm177_vm0, %v338_v33 }
  0xaa   : > { %v324_v34 = vpop.permute.xlu1 %323  ;;  %v257_v35 = vpop.permute.xlu0 %256 }
  0xab   : > { %606 = vst.msk [vmem:[%s812_s19 + $0x100] sm:$0xff] %vm177_vm0, %v324_v34  ;;  %v344_v36 = vpop.permute.xlu2 %343 }
  0xac   : > { %605 = vst.msk [vmem:[%s812_s19 + $0xf8] sm:$0xff] %vm177_vm0, %v257_v35 }
  0xad   : > { %616 = vst.msk [vmem:[%s812_s19 + $0x150] sm:$0xff] %vm177_vm0, %v344_v36 }
  0xb2   : > { %v330_v37 = vpop.permute.xlu1 %329  ;;  %v328_v38 = vpop.permute.xlu0 %327 }
  0xb3   : > { %609 = vst.msk [vmem:[%s812_s19 + $0x118] sm:$0xff] %vm177_vm0, %v330_v37  ;;  %v350_v39 = vpop.permute.xlu2 %349 }
  0xb4   : > { %608 = vst.msk [vmem:[%s812_s19 + $0x110] sm:$0xff] %vm177_vm0, %v328_v38 }
  0xb5   : > { %619 = vst.msk [vmem:[%s812_s19 + $0x168] sm:$0xff] %vm177_vm0, %v350_v39 }
  0xba   : > { %v336_v40 = vpop.permute.xlu1 %335  ;;  %v334_v41 = vpop.permute.xlu0 %333 }
  0xbb   : > { %612 = vst.msk [vmem:[%s812_s19 + $0x130] sm:$0xff] %vm177_vm0, %v336_v40  ;;  %v421_v42 = vpop.permute.xlu2 %420 }
  0xbc   : > { %611 = vst.msk [vmem:[%s812_s19 + $0x128] sm:$0xff] %vm177_vm0, %v334_v41 }
  0xbd   : > { %622 = vst.msk [vmem:[%s812_s19 + $0x180] sm:$0xff] %vm177_vm0, %v421_v42 }
  0xc2   : > { %v342_v43 = vpop.permute.xlu1 %341  ;;  %v340_v44 = vpop.permute.xlu0 %339 }
  0xc3   : > { %615 = vst.msk [vmem:[%s812_s19 + $0x148] sm:$0xff] %vm177_vm0, %v342_v43  ;;  %v427_v45 = vpop.permute.xlu2 %426 }
  0xc4   : > { %614 = vst.msk [vmem:[%s812_s19 + $0x140] sm:$0xff] %vm177_vm0, %v340_v44 }
  0xc5   : > { %625 = vst.msk [vmem:[%s812_s19 + $0x198] sm:$0xff] %vm177_vm0, %v427_v45 }
  0xca   : > { %v348_v46 = vpop.permute.xlu1 %347  ;;  %v346_v47 = vpop.permute.xlu0 %345 }
  0xcb   : > { %618 = vst.msk [vmem:[%s812_s19 + $0x160] sm:$0xff] %vm177_vm0, %v348_v46  ;;  %v433_v48 = vpop.permute.xlu2 %432 }
  0xcc   : > { %617 = vst.msk [vmem:[%s812_s19 + $0x158] sm:$0xff] %vm177_vm0, %v346_v47 }
  0xcd   : > { %628 = vst.msk [vmem:[%s812_s19 + $0x1b0] sm:$0xff] %vm177_vm0, %v433_v48 }
  0xd2   : > { %v354_v49 = vpop.permute.xlu1 %353  ;;  %v352_v50 = vpop.permute.xlu0 %351 }
  0xd3   : > { %621 = vst.msk [vmem:[%s812_s19 + $0x178] sm:$0xff] %vm177_vm0, %v354_v49  ;;  %v439_v51 = vpop.permute.xlu2 %438 }
  0xd4   : > { %620 = vst.msk [vmem:[%s812_s19 + $0x170] sm:$0xff] %vm177_vm0, %v352_v50 }
  0xd5   : > { %631 = vst.msk [vmem:[%s812_s19 + $0x1c8] sm:$0xff] %vm177_vm0, %v439_v51 }
  0xda   : > { %v425_v52 = vpop.permute.xlu1 %424  ;;  %v423_v53 = vpop.permute.xlu0 %422 }
  0xdb   : > { %624 = vst.msk [vmem:[%s812_s19 + $0x190] sm:$0xff] %vm177_vm0, %v425_v52  ;;  %v445_v54 = vpop.permute.xlu2 %444 }
  0xdc   : > { %623 = vst.msk [vmem:[%s812_s19 + $0x188] sm:$0xff] %vm177_vm0, %v423_v53 }
  0xdd   : > { %634 = vst.msk [vmem:[%s812_s19 + $0x1e0] sm:$0xff] %vm177_vm0, %v445_v54 }
  0xe2   : > { %v431_v55 = vpop.permute.xlu1 %430  ;;  %v429_v56 = vpop.permute.xlu0 %428 }
  0xe3   : > { %627 = vst.msk [vmem:[%s812_s19 + $0x1a8] sm:$0xff] %vm177_vm0, %v431_v55  ;;  %v451_v57 = vpop.permute.xlu2 %450 }
  0xe4   : > { %626 = vst.msk [vmem:[%s812_s19 + $0x1a0] sm:$0xff] %vm177_vm0, %v429_v56 }
  0xe5   : > { %637 = vst.msk [vmem:[%s812_s19 + $0x1f8] sm:$0xff] %vm177_vm0, %v451_v57 }
  0xea   : > { %v437_v58 = vpop.permute.xlu1 %436  ;;  %v435_v59 = vpop.permute.xlu0 %434 }
  0xeb   : > { %630 = vst.msk [vmem:[%s812_s19 + $0x1c0] sm:$0xff] %vm177_vm0, %v437_v58 }
  0xec   : > { %629 = vst.msk [vmem:[%s812_s19 + $0x1b8] sm:$0xff] %vm177_vm0, %v435_v59 }
  0xf2   : > { %v443_v60 = vpop.permute.xlu1 %442  ;;  %v441_v61 = vpop.permute.xlu0 %440 }
  0xf3   : > { %633 = vst.msk [vmem:[%s812_s19 + $0x1d8] sm:$0xff] %vm177_vm0, %v443_v60 }
  0xf4   : > { %632 = vst.msk [vmem:[%s812_s19 + $0x1d0] sm:$0xff] %vm177_vm0, %v441_v61 }
  0xfa   : > { %v449_v62 = vpop.permute.xlu1 %448  ;;  %v447_v63 = vpop.permute.xlu0 %446 }
  0xfb   : > { %636 = vst.msk [vmem:[%s812_s19 + $0x1f0] sm:$0xff] %vm177_vm0, %v449_v62 }
  0xfc   : > { %635 = vst.msk [vmem:[%s812_s19 + $0x1e8] sm:$0xff] %vm177_vm0, %v447_v63 }
  0xfd PF: > { %s11_s8 = sadd.s32 1, %s691_s8   ;;  %s991_s6 = smov %s687_s7 }
  0xfe   : > { %p8_p5 = scmp.ge.s32.totalorder %s11_s8, 4   ;;  %s992_s7 = smov %s994_s9 }
 0x100   :  { %10 = sbr.rel (!%p8_p5) target bundleno = 2 (0x2), region = 57 }

</bundles_post_ra>
